<compile_context>
chip_gen: v5e
topology: v5e:2x2
jax: 0.10.0
libtpu: 0.0.40
codegen_flags: <defaults>
</compile_context>

<pallas_src>
import jax
import jax.numpy as jnp
from jax.experimental import pallas as pl
from jax.experimental.pallas import tpu as pltpu


def _num_tensorcores():
    """Best-effort TensorCore count per chip (v7x / v4 / v5p expose 2)."""
    try:
        kind = jax.devices()[0].device_kind.lower()
    except Exception:
        return 1
    return 2 if any(t in kind for t in ("v4", "v5p", "7")) else 1


def _round_up(a, m):
    return pl.cdiv(a, m) * m


def _pick_row_block(rows_in, w, s_rows, lanes, itemsize, *, num_cores,
                    target_out_bytes=2 << 20, vmem_budget=20 << 20):
    """Input-row block size: multiple of 8, output block ~target_out_bytes,
    double-buffered working set within vmem_budget, >= num_cores grid steps
    on multi-TensorCore chips."""
    lanes_pad = _round_up(lanes, 128)                    # VMEM lane padding
    w_pad = _round_up(w, 128)
    out_row_bytes = s_rows * lanes_pad * itemsize        # output side, per input row
    in_row_bytes = w_pad * itemsize
    r_bytes = 2 * _round_up(w, 8) * lanes_pad * itemsize  # double-buffered R

    rb_target = target_out_bytes // out_row_bytes
    rb_vmem = (vmem_budget - r_bytes) // (2 * (out_row_bytes + in_row_bytes))
    rb = min(rb_target, rb_vmem)
    rb = min(rb, _round_up(rows_in, 8))                  # never bigger than problem
    if num_cores > 1:                                    # balanced steps for both TCs
        rb = min(rb, _round_up(pl.cdiv(rows_in, num_cores), 8))
    rb = (rb // 8) * 8
    return int(max(8, rb))


def _make_kernel(rb, s_rows, acc_dtype):
    def kernel(x_ref, r_ref, o_ref):
        # One MXU matmul does the column replication (exact one-hot select):
        #   y[r, k] = x[r, k // s]
        y = jnp.dot(x_ref[...], r_ref[...],
                    preferred_element_type=acc_dtype).astype(o_ref.dtype)
        if s_rows == 1:
            o_ref[...] = y                               # rows already replicated
        else:
            # Row replication in the final layout: out[r*s + dh, :] = y[r, :]
            # via `s` sublane-strided stores into the output block.
            for dh in range(s_rows):
                o_ref[pl.ds(dh, rb, stride=s_rows), :] = y
    return kernel


def _upscale_2d(x2d, s, *, rows_in_kernel):
    """x2d: (R, W) -> (R * (s if rows_in_kernel else 1), W*s), nearest."""
    rows_in, w = x2d.shape
    dtype = x2d.dtype
    itemsize = jnp.dtype(dtype).itemsize
    s_rows = s if rows_in_kernel else 1
    lanes = w * s
    rows_out = rows_in * s_rows

    # One-hot column-replication matrix: r[wi, k] = 1 iff k // s == wi.
    # Pure selection -> exact in any dtype.
    r = (jnp.arange(lanes)[None, :] // s == jnp.arange(w)[:, None]).astype(dtype)

    rb = _pick_row_block(rows_in, w, s_rows, lanes, itemsize,
                         num_cores=_num_tensorcores())
    grid = (pl.cdiv(rows_in, rb),)

    acc_dtype = jnp.float32 if jnp.issubdtype(dtype, jnp.floating) else jnp.int32
    # TODO(synk): integer inputs take a non-MXU dot path on v7x; a copy-based
    # replication would be preferable for int dtypes.

    lanes_pad = _round_up(lanes, 128)
    w_pad = _round_up(w, 128)
    working_set = (2 * rb * (w_pad + s_rows * lanes_pad)
                   + 2 * _round_up(w, 8) * lanes_pad) * itemsize
    vmem_limit = int(min(64 << 20, max(32 << 20, working_set + (4 << 20))))

    return pl.pallas_call(
        _make_kernel(rb, s_rows, acc_dtype),
        out_shape=jax.ShapeDtypeStruct((rows_out, lanes), dtype),
        grid_spec=pl.GridSpec(
            grid=grid,
            in_specs=[
                pl.BlockSpec((rb, w), lambda i: (i, 0)),      # x row block
                pl.BlockSpec((w, lanes), lambda i: (0, 0)),   # R (constant -> fetched once)
            ],
            out_specs=pl.BlockSpec((rb * s_rows, lanes), lambda i: (i, 0)),
        ),
        compiler_params=pltpu.CompilerParams(
            dimension_semantics=("parallel",),
            vmem_limit_bytes=vmem_limit,
        ),
        cost_estimate=pl.CostEstimate(
            flops=2 * rows_in * w * lanes,
            transcendentals=0,
            bytes_accessed=(rows_in * w + rows_out * lanes + w * lanes) * itemsize,
        ),
    )(x2d, r)


_DIRECT_OK = None


def _direct_path_ok():
    """Probe (once, tiny input) whether the sublane-strided store lowers and
    is correct on this Mosaic/TPU version; otherwise use the fallback path."""
    global _DIRECT_OK
    if _DIRECT_OK is None:
        try:
            probe = jnp.arange(64 * 16, dtype=jnp.float32).reshape(64, 16)
            got = _upscale_2d(probe, 4, rows_in_kernel=True)
            ref = jnp.repeat(jnp.repeat(probe, 4, axis=0), 4, axis=1)
            _DIRECT_OK = bool(jnp.array_equal(got, ref))
        except Exception:
            _DIRECT_OK = False
    return _DIRECT_OK


def upscale_nearest(x, scale_factor=4):
    """x: (N, C, H, W) -> (N, C, H*s, W*s).  Matches
    F.interpolate(x, scale_factor=s) with the default mode='nearest'
    (floor indexing: out[..., oh, ow] = x[..., oh // s, ow // s])."""
    n, c, h, w = x.shape
    s = int(scale_factor)
    # TODO(synk): non-integer scale_factor (needs gather indexing) not implemented.
    if s == 1:
        return x

    x2d = x.reshape(n * c * h, w)
    if _direct_path_ok():
        # Kernel reads original rows and writes the final (N*C*H*s, W*s)
        # layout directly (row replication in-kernel via strided stores).
        out2d = _upscale_2d(x2d, s, rows_in_kernel=True)
    else:
        # Fallback: XLA replicates input rows (s x smaller than the output);
        # the kernel does only the lane replication + dense stores.
        out2d = _upscale_2d(jnp.repeat(x2d, s, axis=0), s, rows_in_kernel=False)

    # (N*C*H*s, W*s) -> (N, C, H*s, W*s): splits major dims only and keeps the
    # lane dim, so this reshape is a bitcast (no relayout of the big output).
    return out2d.reshape(n, c, h * s, w * s)


if __name__ == "__main__":
    key = jax.random.PRNGKey(0)
    x = jax.random.normal(key, (2, 4, 16, 16), dtype=jnp.float32)

    y = jax.block_until_ready(upscale_nearest(x, scale_factor=4))

    # Reference: nearest-neighbor upsample (same semantics as F.interpolate
    # with default mode='nearest' and integer scale factor).
    ref = jnp.repeat(jnp.repeat(x, 4, axis=2), 4, axis=3)

    assert y.shape == (2, 4, 64, 64), y.shape
    assert y.dtype == x.dtype
    assert jnp.array_equal(y, ref), float(jnp.abs(y - ref).max())

    print("KERNEL_OK")
</pallas_src>

<mosaic_0001>
module attributes {stable_mosaic.version = 11 : i64} {
  func.func @kernel(%arg0: i32, %arg1: memref<64x16xf32, #tpu.memory_space<vmem>>, %arg2: memref<16x64xf32, #tpu.memory_space<vmem>>, %arg3: memref<256x64xf32, #tpu.memory_space<vmem>>) attributes {dimension_semantics = [#tpu.dimension_semantics<parallel>], iteration_bounds = array<i64: 1>, scalar_prefetch = 0 : i64, scratch_operands = 0 : i64, tpu.core_type = #tpu.core_type<tc>, window_params = [{transform_indices = @transform_0, window_bounds = array<i64: 64, 16>}, {pipeline_mode = #tpu.pipeline_mode<synchronous>, transform_indices = @transform_1, window_bounds = array<i64: 16, 64>}, {transform_indices = @transform_2, window_bounds = array<i64: 256, 64>}]} {
    %c0 = arith.constant 0 : index
    %c0_0 = arith.constant 0 : index
    %0 = vector.load %arg1[%c0, %c0_0] : memref<64x16xf32, #tpu.memory_space<vmem>>, vector<64x16xf32>
    %c0_1 = arith.constant 0 : index
    %c0_2 = arith.constant 0 : index
    %1 = vector.load %arg2[%c0_1, %c0_2] : memref<16x64xf32, #tpu.memory_space<vmem>>, vector<16x64xf32>
    %cst = arith.constant dense<0.000000e+00> : vector<64x64xf32>
    %2 = tpu.matmul %0, %1, %cst {dimension_numbers = #tpu.dot_dimension_numbers<[1], [0], [0], [1], [0, 0, 1, 1], [], []>} : vector<64x16xf32>, vector<16x64xf32>, vector<64x64xf32> -> vector<64x64xf32>
    %c0_3 = arith.constant 0 : index
    %c0_4 = arith.constant 0 : index
    %3 = tpu.strided_load %arg3[%c0_3, %c0_4] {strides = array<i32: 4, 1>} : memref<256x64xf32, #tpu.memory_space<vmem>>, vector<64x64xf32>
    tpu.strided_store %arg3[%c0_3, %c0_4], %2 {strides = array<i32: 4, 1>} : memref<256x64xf32, #tpu.memory_space<vmem>>, vector<64x64xf32>
    %c1 = arith.constant 1 : index
    %c0_5 = arith.constant 0 : index
    %4 = tpu.strided_load %arg3[%c1, %c0_5] {strides = array<i32: 4, 1>} : memref<256x64xf32, #tpu.memory_space<vmem>>, vector<64x64xf32>
    tpu.strided_store %arg3[%c1, %c0_5], %2 {strides = array<i32: 4, 1>} : memref<256x64xf32, #tpu.memory_space<vmem>>, vector<64x64xf32>
    %c2 = arith.constant 2 : index
    %c0_6 = arith.constant 0 : index
    %5 = tpu.strided_load %arg3[%c2, %c0_6] {strides = array<i32: 4, 1>} : memref<256x64xf32, #tpu.memory_space<vmem>>, vector<64x64xf32>
    tpu.strided_store %arg3[%c2, %c0_6], %2 {strides = array<i32: 4, 1>} : memref<256x64xf32, #tpu.memory_space<vmem>>, vector<64x64xf32>
    %c3 = arith.constant 3 : index
    %c0_7 = arith.constant 0 : index
    %6 = tpu.strided_load %arg3[%c3, %c0_7] {strides = array<i32: 4, 1>} : memref<256x64xf32, #tpu.memory_space<vmem>>, vector<64x64xf32>
    tpu.strided_store %arg3[%c3, %c0_7], %2 {strides = array<i32: 4, 1>} : memref<256x64xf32, #tpu.memory_space<vmem>>, vector<64x64xf32>
    return
  }
  func.func @transform_0(%arg0: i32) -> (i32, i32) {
    %c0_i32 = arith.constant 0 : i32
    %c0_i32_0 = arith.constant 0 : i32
    return %arg0, %c0_i32 : i32, i32
  }
  func.func @transform_1(%arg0: i32) -> (i32, i32) {
    %c0_i32 = arith.constant 0 : i32
    %c0_i32_0 = arith.constant 0 : i32
    %c0_i32_1 = arith.constant 0 : i32
    return %c0_i32, %c0_i32_0 : i32, i32
  }
  func.func @transform_2(%arg0: i32) -> (i32, i32) {
    %c0_i32 = arith.constant 0 : i32
    %c0_i32_0 = arith.constant 0 : i32
    return %arg0, %c0_i32 : i32, i32
  }
}

module attributes {stable_mosaic.version = 11 : i64} {
  func.func @kernel(%arg0: i32, %arg1: memref<512x16xf32, #tpu.memory_space<vmem>>, %arg2: memref<16x64xf32, #tpu.memory_space<vmem>>, %arg3: memref<512x64xf32, #tpu.memory_space<vmem>>) attributes {dimension_semantics = [#tpu.dimension_semantics<parallel>], iteration_bounds = array<i64: 1>, scalar_prefetch = 0 : i64, scratch_operands = 0 : i64, tpu.core_type = #tpu.core_type<tc>, window_params = [{transform_indices = @transform_0, window_bounds = array<i64: 512, 16>}, {pipeline_mode = #tpu.pipeline_mode<synchronous>, transform_indices = @transform_1, window_bounds = array<i64: 16, 64>}, {transform_indices = @transform_2, window_bounds = array<i64: 512, 64>}]} {
    %c0 = arith.constant 0 : index
    %c0_0 = arith.constant 0 : index
    %0 = vector.load %arg1[%c0, %c0_0] : memref<512x16xf32, #tpu.memory_space<vmem>>, vector<512x16xf32>
    %c0_1 = arith.constant 0 : index
    %c0_2 = arith.constant 0 : index
    %1 = vector.load %arg2[%c0_1, %c0_2] : memref<16x64xf32, #tpu.memory_space<vmem>>, vector<16x64xf32>
    %cst = arith.constant dense<0.000000e+00> : vector<512x64xf32>
    %2 = tpu.matmul %0, %1, %cst {dimension_numbers = #tpu.dot_dimension_numbers<[1], [0], [0], [1], [0, 0, 1, 1], [], []>} : vector<512x16xf32>, vector<16x64xf32>, vector<512x64xf32> -> vector<512x64xf32>
    %c0_3 = arith.constant 0 : index
    %c0_4 = arith.constant 0 : index
    %3 = vector.load %arg3[%c0_3, %c0_4] : memref<512x64xf32, #tpu.memory_space<vmem>>, vector<512x64xf32>
    tpu.vector_store %arg3[%c0_3, %c0_4], %2 {strides = array<i32>} : memref<512x64xf32, #tpu.memory_space<vmem>>, vector<512x64xf32>,
    return
  }
  func.func @transform_0(%arg0: i32) -> (i32, i32) {
    %c0_i32 = arith.constant 0 : i32
    %c0_i32_0 = arith.constant 0 : i32
    return %arg0, %c0_i32 : i32, i32
  }
  func.func @transform_1(%arg0: i32) -> (i32, i32) {
    %c0_i32 = arith.constant 0 : i32
    %c0_i32_0 = arith.constant 0 : i32
    %c0_i32_1 = arith.constant 0 : i32
    return %c0_i32, %c0_i32_0 : i32, i32
  }
  func.func @transform_2(%arg0: i32) -> (i32, i32) {
    %c0_i32 = arith.constant 0 : i32
    %c0_i32_0 = arith.constant 0 : i32
    return %arg0, %c0_i32 : i32, i32
  }
}

</mosaic_0001>

<bundles_post_ra>
// kernel: tpu_custom_call.1
= control target key start
LH: loop header
LB: loop body
LE: loop exit
PB: predicated region body
PF: predicated region fallthrough
CT: control target
= control target key end

     0   :  { %vm21_vm0 = vcmask 130048   ;;  %s348_s1 = inlined_call_operand.vmem [shape: f32[16,64], index: 1, kind: input, shape index: {}]   ;;  %s349_s0 = inlined_call_operand.vmem [shape: f32[64,16], index: 0, kind: input, shape index: {}]   ;;  %s350_s2 = inlined_call_operand.vmem [shape: f32[256,64], index: 2, kind: output, shape index: {}]  }
   0x1   :  { %v20_v0 = vld [vmem:[%s348_s1 + $0x8] sm:$0xff]  ;;  %v19_v1 = vld [vmem:[%s348_s1] sm:$0xff]  ;;  %v17_v3 = vld [vmem:[%s349_s0 + $0x30] sm:$0xff] }
   0x2   :  { %194 = vmatpush.msra.mxu2 %v20_v0  ;;  %195 = vmatpush.msra.mxu3 %v20_v0  ;;  %v15_v2 = vld [vmem:[%s349_s0 + $0x20] sm:$0xff]  ;;  %v13_v5 = vld [vmem:[%s349_s0 + $0x10] sm:$0xff]  ;;  %v16_v6 = vld [vmem:[%s349_s0 + $0x28] sm:$0xff] }
   0x3   :  { %60 = vmatpush.msra.mxu0 %v20_v0  ;;  %193 = vmatpush.msra.mxu1 %v20_v0  ;;  %v11_v4 = vld [vmem:[%s349_s0] sm:$0xff]  ;;  %v18_v7 = vld [vmem:[%s349_s0 + $0x38] sm:$0xff]  ;;  %v12_v8 = vld [vmem:[%s349_s0 + $0x8] sm:$0xff] }
   0x4   :  { %197 = vmatpush.msra.mxu2 %v19_v1  ;;  %198 = vmatpush.msra.mxu3 %v19_v1  ;;  %v14_v9 = vld [vmem:[%s349_s0 + $0x18] sm:$0xff] }
   0x5   :  { %158 = vmatmul.msk.f32.vlgmr.msra.gmra.mxu2 %vm21_vm0, %v15_v2  ;;  %160 = vmatmul.msk.f32.vlgmr.msra.gmra.mxu3 %vm21_vm0, %v17_v3 }
   0x6   :  { %61 = vmatpush.msra.mxu0 %v19_v1  ;;  %196 = vmatpush.msra.mxu1 %v19_v1 }
   0x7   :  { %154 = vmatmul.msk.f32.vlgmr.msra.gmra.mxu0 %vm21_vm0, %v11_v4  ;;  %156 = vmatmul.msk.f32.vlgmr.msra.gmra.mxu1 %vm21_vm0, %v13_v5 }
   0xd   :  { %159 = vmatmul.msk.f32.gmra.mxu2 %vm21_vm0, %v16_v6  ;;  %161 = vmatmul.msk.f32.gmra.mxu3 %vm21_vm0, %v18_v7 }
   0xf   :  { %155 = vmatmul.msk.f32.gmra.mxu0 %vm21_vm0, %v12_v8  ;;  %157 = vmatmul.msk.f32.gmra.mxu1 %vm21_vm0, %v14_v9 }
  0x84   :  { %v63_v10 = vpop.f32.mrf.mxu0  ;;  %v69_v11 = vpop.f32.mrf.mxu1 }
  0x85   :  { %87 = vst [vmem:[%s350_s2] ss:$4 sm:$0xff] %v63_v10 }
  0x86   :  { %169 = vst [vmem:[%s350_s2 + $0x1] ss:$4 sm:$0xff] %v63_v10 }
  0x87   :  { %177 = vst [vmem:[%s350_s2 + $0x2] ss:$4 sm:$0xff] %v63_v10 }
  0x88   :  { %185 = vst [vmem:[%s350_s2 + $0x3] ss:$4 sm:$0xff] %v63_v10  ;;  %v75_v12 = vpop.f32.mrf.mxu2  ;;  %v81_v13 = vpop.f32.mrf.mxu3 }
  0x89   :  { %163 = vst [vmem:[%s350_s2 + $0x40] ss:$4 sm:$0xff] %v69_v11 }
  0x8a   :  { %171 = vst [vmem:[%s350_s2 + $0x41] ss:$4 sm:$0xff] %v69_v11 }
  0x8b   :  { %179 = vst [vmem:[%s350_s2 + $0x42] ss:$4 sm:$0xff] %v69_v11 }
  0x8c   :  { %187 = vst [vmem:[%s350_s2 + $0x43] ss:$4 sm:$0xff] %v69_v11  ;;  %v66_v14 = vpop.f32.mrf.mxu0  ;;  %v72_v15 = vpop.f32.mrf.mxu1 }
  0x8d   :  { %165 = vst [vmem:[%s350_s2 + $0x80] ss:$4 sm:$0xff] %v75_v12 }
  0x8e   :  { %173 = vst [vmem:[%s350_s2 + $0x81] ss:$4 sm:$0xff] %v75_v12 }
  0x8f   :  { %181 = vst [vmem:[%s350_s2 + $0x82] ss:$4 sm:$0xff] %v75_v12 }
  0x90   :  { %189 = vst [vmem:[%s350_s2 + $0x83] ss:$4 sm:$0xff] %v75_v12  ;;  %v78_v16 = vpop.f32.mrf.mxu2  ;;  %v84_v17 = vpop.f32.mrf.mxu3 }
  0x91   :  { %167 = vst [vmem:[%s350_s2 + $0xc0] ss:$4 sm:$0xff] %v81_v13 }
  0x92   :  { %175 = vst [vmem:[%s350_s2 + $0xc1] ss:$4 sm:$0xff] %v81_v13 }
  0x93   :  { %183 = vst [vmem:[%s350_s2 + $0xc2] ss:$4 sm:$0xff] %v81_v13 }
  0x94   :  { %191 = vst [vmem:[%s350_s2 + $0xc3] ss:$4 sm:$0xff] %v81_v13 }
  0x95   :  { %162 = vst [vmem:[%s350_s2 + $0x20] ss:$4 sm:$0xff] %v66_v14 }
  0x96   :  { %170 = vst [vmem:[%s350_s2 + $0x21] ss:$4 sm:$0xff] %v66_v14 }
  0x97   :  { %178 = vst [vmem:[%s350_s2 + $0x22] ss:$4 sm:$0xff] %v66_v14 }
  0x98   :  { %186 = vst [vmem:[%s350_s2 + $0x23] ss:$4 sm:$0xff] %v66_v14 }
  0x99   :  { %164 = vst [vmem:[%s350_s2 + $0x60] ss:$4 sm:$0xff] %v72_v15 }
  0x9a   :  { %172 = vst [vmem:[%s350_s2 + $0x61] ss:$4 sm:$0xff] %v72_v15 }
  0x9b   :  { %180 = vst [vmem:[%s350_s2 + $0x62] ss:$4 sm:$0xff] %v72_v15 }
  0x9c   :  { %188 = vst [vmem:[%s350_s2 + $0x63] ss:$4 sm:$0xff] %v72_v15 }
  0x9d   :  { %166 = vst [vmem:[%s350_s2 + $0xa0] ss:$4 sm:$0xff] %v78_v16 }
  0x9e   :  { %174 = vst [vmem:[%s350_s2 + $0xa1] ss:$4 sm:$0xff] %v78_v16 }
  0x9f   :  { %182 = vst [vmem:[%s350_s2 + $0xa2] ss:$4 sm:$0xff] %v78_v16 }
  0xa0   :  { %190 = vst [vmem:[%s350_s2 + $0xa3] ss:$4 sm:$0xff] %v78_v16 }
  0xa1   :  { %168 = vst [vmem:[%s350_s2 + $0xe0] ss:$4 sm:$0xff] %v84_v17 }
  0xa2   :  { %176 = vst [vmem:[%s350_s2 + $0xe1] ss:$4 sm:$0xff] %v84_v17 }
  0xa3   :  { %184 = vst [vmem:[%s350_s2 + $0xe2] ss:$4 sm:$0xff] %v84_v17 }
  0xa4   :  { %192 = vst [vmem:[%s350_s2 + $0xe3] ss:$4 sm:$0xff] %v84_v17 }

// kernel: tpu_custom_call.1
= control target key start
LH: loop header
LB: loop body
LE: loop exit
PB: predicated region body
PF: predicated region fallthrough
CT: control target
= control target key end

     0   :  { %vm77_vm0 = vcmask 130048   ;;  %vm479_vm1 = vcmask 523264   ;;  %s1151_s1 = inlined_call_operand.vmem [shape: f32[16,64], index: 1, kind: input, shape index: {}]   ;;  %s1152_s0 = inlined_call_operand.vmem [shape: f32[512,16], index: 0, kind: input, shape index: {}]   ;;  %s1153_s2 = inlined_call_operand.vmem [shape: f32[512,64], index: 2, kind: output, shape index: {}]  }
   0x1   :  { %v76_v0 = vld [vmem:[%s1151_s1 + $0x8] sm:$0xff]  ;;  %v75_v1 = vld [vmem:[%s1151_s1] sm:$0xff]  ;;  %v45_v10 = vld [vmem:[%s1152_s0 + $0x110] sm:$0xff] }
   0x2   :  { %613 = vmatpush.msra.mxu2 %v76_v0  ;;  %614 = vmatpush.msra.mxu3 %v76_v0  ;;  %v43_v2 = vld [vmem:[%s1152_s0 + $0x100] sm:$0xff]  ;;  %v44_v6 = vld [vmem:[%s1152_s0 + $0x108] sm:$0xff]  ;;  %v61_v11 = vld [vmem:[%s1152_s0 + $0x190] sm:$0xff] }
   0x3   :  { %v59_v3 = vld [vmem:[%s1152_s0 + $0x180] sm:$0xff]  ;;  %284 = vmatpush.msra.mxu0 %v76_v0  ;;  %612 = vmatpush.msra.mxu1 %v76_v0  ;;  %v60_v7 = vld [vmem:[%s1152_s0 + $0x188] sm:$0xff]  ;;  %v13_v12 = vld [vmem:[%s1152_s0 + $0x10] sm:$0xff] }
   0x4   :  { %616 = vmatpush.msra.mxu2 %v75_v1  ;;  %617 = vmatpush.msra.mxu3 %v75_v1  ;;  %v11_v4 = vld [vmem:[%s1152_s0] sm:$0xff]  ;;  %v12_v8 = vld [vmem:[%s1152_s0 + $0x8] sm:$0xff]  ;;  %v29_v13 = vld [vmem:[%s1152_s0 + $0x90] sm:$0xff] }
   0x5   :  { %v27_v5 = vld [vmem:[%s1152_s0 + $0x80] sm:$0xff]  ;;  %580 = vmatmul.msk.f32.vlgmr.msra.gmra.mxu2 %vm77_vm0, %v43_v2  ;;  %596 = vmatmul.msk.f32.vlgmr.msra.gmra.mxu3 %vm77_vm0, %v59_v3  ;;  %v28_v9 = vld [vmem:[%s1152_s0 + $0x88] sm:$0xff]  ;;  %v46_v14 = vld [vmem:[%s1152_s0 + $0x118] sm:$0xff] }
   0x6   :  { %285 = vmatpush.msra.mxu0 %v75_v1  ;;  %615 = vmatpush.msra.mxu1 %v75_v1  ;;  %v62_v15 = vld [vmem:[%s1152_s0 + $0x198] sm:$0xff]  ;;  %v47_v18 = vld [vmem:[%s1152_s0 + $0x120] sm:$0xff]  ;;  %v48_v22 = vld [vmem:[%s1152_s0 + $0x128] sm:$0xff] }
   0x7   :  { %548 = vmatmul.msk.f32.vlgmr.msra.gmra.mxu0 %vm77_vm0, %v11_v4  ;;  %564 = vmatmul.msk.f32.vlgmr.msra.gmra.mxu1 %vm77_vm0, %v27_v5  ;;  %v14_v16 = vld [vmem:[%s1152_s0 + $0x18] sm:$0xff]  ;;  %v63_v19 = vld [vmem:[%s1152_s0 + $0x1a0] sm:$0xff]  ;;  %v64_v23 = vld [vmem:[%s1152_s0 + $0x1a8] sm:$0xff] }
   0x8   :  { %v30_v17 = vld [vmem:[%s1152_s0 + $0x98] sm:$0xff]  ;;  %v15_v20 = vld [vmem:[%s1152_s0 + $0x20] sm:$0xff]  ;;  %v16_v24 = vld [vmem:[%s1152_s0 + $0x28] sm:$0xff] }
   0x9   :  { %v31_v21 = vld [vmem:[%s1152_s0 + $0xa0] sm:$0xff]  ;;  %v32_v25 = vld [vmem:[%s1152_s0 + $0xa8] sm:$0xff]  ;;  %v49_v26 = vld [vmem:[%s1152_s0 + $0x130] sm:$0xff] }
   0xa   :  { %v65_v27 = vld [vmem:[%s1152_s0 + $0x1b0] sm:$0xff]  ;;  %v50_v30 = vld [vmem:[%s1152_s0 + $0x138] sm:$0xff]  ;;  %v51_v34 = vld [vmem:[%s1152_s0 + $0x140] sm:$0xff] }
   0xb   :  { %v17_v28 = vld [vmem:[%s1152_s0 + $0x30] sm:$0xff]  ;;  %v66_v31 = vld [vmem:[%s1152_s0 + $0x1b8] sm:$0xff]  ;;  %v67_v35 = vld [vmem:[%s1152_s0 + $0x1c0] sm:$0xff] }
   0xc   :  { %v33_v29 = vld [vmem:[%s1152_s0 + $0xb0] sm:$0xff]  ;;  %v18_v32 = vld [vmem:[%s1152_s0 + $0x38] sm:$0xff]  ;;  %v19_v36 = vld [vmem:[%s1152_s0 + $0x40] sm:$0xff] }
   0xd   :  { %581 = vmatmul.msk.f32.gmra.mxu2 %vm77_vm0, %v44_v6  ;;  %597 = vmatmul.msk.f32.gmra.mxu3 %vm77_vm0, %v60_v7  ;;  %v34_v33 = vld [vmem:[%s1152_s0 + $0xb8] sm:$0xff]  ;;  %v35_v37 = vld [vmem:[%s1152_s0 + $0xc0] sm:$0xff]  ;;  %v52_v38 = vld [vmem:[%s1152_s0 + $0x148] sm:$0xff] }
   0xe   :  { %v68_v39 = vld [vmem:[%s1152_s0 + $0x1c8] sm:$0xff]  ;;  %v53_v42 = vld [vmem:[%s1152_s0 + $0x150] sm:$0xff]  ;;  %v54_v46 = vld [vmem:[%s1152_s0 + $0x158] sm:$0xff] }
   0xf   :  { %549 = vmatmul.msk.f32.gmra.mxu0 %vm77_vm0, %v12_v8  ;;  %565 = vmatmul.msk.f32.gmra.mxu1 %vm77_vm0, %v28_v9  ;;  %v20_v40 = vld [vmem:[%s1152_s0 + $0x48] sm:$0xff]  ;;  %v69_v43 = vld [vmem:[%s1152_s0 + $0x1d0] sm:$0xff]  ;;  %v70_v47 = vld [vmem:[%s1152_s0 + $0x1d8] sm:$0xff] }
  0x10   :  { %v36_v41 = vld [vmem:[%s1152_s0 + $0xc8] sm:$0xff]  ;;  %v21_v44 = vld [vmem:[%s1152_s0 + $0x50] sm:$0xff]  ;;  %v22_v48 = vld [vmem:[%s1152_s0 + $0x58] sm:$0xff] }
  0x11   :  { %v37_v45 = vld [vmem:[%s1152_s0 + $0xd0] sm:$0xff]  ;;  %v38_v49 = vld [vmem:[%s1152_s0 + $0xd8] sm:$0xff]  ;;  %v55_v50 = vld [vmem:[%s1152_s0 + $0x160] sm:$0xff] }
  0x12   :  { %v71_v51 = vld [vmem:[%s1152_s0 + $0x1e0] sm:$0xff]  ;;  %v56_v54 = vld [vmem:[%s1152_s0 + $0x168] sm:$0xff]  ;;  %v57_v58 = vld [vmem:[%s1152_s0 + $0x170] sm:$0xff] }
  0x13   :  { %v23_v52 = vld [vmem:[%s1152_s0 + $0x60] sm:$0xff]  ;;  %v72_v55 = vld [vmem:[%s1152_s0 + $0x1e8] sm:$0xff]  ;;  %v73_v59 = vld [vmem:[%s1152_s0 + $0x1f0] sm:$0xff] }
  0x14   :  { %v39_v53 = vld [vmem:[%s1152_s0 + $0xe0] sm:$0xff]  ;;  %v24_v56 = vld [vmem:[%s1152_s0 + $0x68] sm:$0xff]  ;;  %v25_v60 = vld [vmem:[%s1152_s0 + $0x70] sm:$0xff] }
  0x15   :  { %582 = vmatmul.msk.f32.gmra.mxu2 %vm77_vm0, %v45_v10  ;;  %598 = vmatmul.msk.f32.gmra.mxu3 %vm77_vm0, %v61_v11  ;;  %v40_v57 = vld [vmem:[%s1152_s0 + $0xe8] sm:$0xff]  ;;  %v41_v61 = vld [vmem:[%s1152_s0 + $0xf0] sm:$0xff]  ;;  %v58_v62 = vld [vmem:[%s1152_s0 + $0x178] sm:$0xff] }
  0x16   :  { %v74_v63 = vld [vmem:[%s1152_s0 + $0x1f8] sm:$0xff] }
  0x17   :  { %550 = vmatmul.msk.f32.gmra.mxu0 %vm77_vm0, %v13_v12  ;;  %566 = vmatmul.msk.f32.gmra.mxu1 %vm77_vm0, %v29_v13  ;;  %v26_v0 = vld [vmem:[%s1152_s0 + $0x78] sm:$0xff] }
  0x18   :  { %v42_v1 = vld [vmem:[%s1152_s0 + $0xf8] sm:$0xff] }
  0x1d   :  { %583 = vmatmul.msk.f32.gmra.mxu2 %vm77_vm0, %v46_v14  ;;  %599 = vmatmul.msk.f32.gmra.mxu3 %vm77_vm0, %v62_v15 }
  0x1f   :  { %551 = vmatmul.msk.f32.gmra.mxu0 %vm77_vm0, %v14_v16  ;;  %567 = vmatmul.msk.f32.gmra.mxu1 %vm77_vm0, %v30_v17 }
  0x25   :  { %584 = vmatmul.msk.f32.gmra.mxu2 %vm77_vm0, %v47_v18  ;;  %600 = vmatmul.msk.f32.gmra.mxu3 %vm77_vm0, %v63_v19 }
  0x27   :  { %552 = vmatmul.msk.f32.gmra.mxu0 %vm77_vm0, %v15_v20  ;;  %568 = vmatmul.msk.f32.gmra.mxu1 %vm77_vm0, %v31_v21 }
  0x2d   :  { %585 = vmatmul.msk.f32.gmra.mxu2 %vm77_vm0, %v48_v22  ;;  %601 = vmatmul.msk.f32.gmra.mxu3 %vm77_vm0, %v64_v23 }
  0x2f   :  { %553 = vmatmul.msk.f32.gmra.mxu0 %vm77_vm0, %v16_v24  ;;  %569 = vmatmul.msk.f32.gmra.mxu1 %vm77_vm0, %v32_v25 }
  0x35   :  { %586 = vmatmul.msk.f32.gmra.mxu2 %vm77_vm0, %v49_v26  ;;  %602 = vmatmul.msk.f32.gmra.mxu3 %vm77_vm0, %v65_v27 }
  0x37   :  { %554 = vmatmul.msk.f32.gmra.mxu0 %vm77_vm0, %v17_v28  ;;  %570 = vmatmul.msk.f32.gmra.mxu1 %vm77_vm0, %v33_v29 }
  0x3d   :  { %587 = vmatmul.msk.f32.gmra.mxu2 %vm77_vm0, %v50_v30  ;;  %603 = vmatmul.msk.f32.gmra.mxu3 %vm77_vm0, %v66_v31 }
  0x3f   :  { %555 = vmatmul.msk.f32.gmra.mxu0 %vm77_vm0, %v18_v32  ;;  %571 = vmatmul.msk.f32.gmra.mxu1 %vm77_vm0, %v34_v33 }
  0x45   :  { %588 = vmatmul.msk.f32.gmra.mxu2 %vm77_vm0, %v51_v34  ;;  %604 = vmatmul.msk.f32.gmra.mxu3 %vm77_vm0, %v67_v35 }
  0x47   :  { %556 = vmatmul.msk.f32.gmra.mxu0 %vm77_vm0, %v19_v36  ;;  %572 = vmatmul.msk.f32.gmra.mxu1 %vm77_vm0, %v35_v37 }
  0x4d   :  { %589 = vmatmul.msk.f32.gmra.mxu2 %vm77_vm0, %v52_v38  ;;  %605 = vmatmul.msk.f32.gmra.mxu3 %vm77_vm0, %v68_v39 }
  0x4f   :  { %557 = vmatmul.msk.f32.gmra.mxu0 %vm77_vm0, %v20_v40  ;;  %573 = vmatmul.msk.f32.gmra.mxu1 %vm77_vm0, %v36_v41 }
  0x55   :  { %590 = vmatmul.msk.f32.gmra.mxu2 %vm77_vm0, %v53_v42  ;;  %606 = vmatmul.msk.f32.gmra.mxu3 %vm77_vm0, %v69_v43 }
  0x57   :  { %558 = vmatmul.msk.f32.gmra.mxu0 %vm77_vm0, %v21_v44  ;;  %574 = vmatmul.msk.f32.gmra.mxu1 %vm77_vm0, %v37_v45 }
  0x5d   :  { %591 = vmatmul.msk.f32.gmra.mxu2 %vm77_vm0, %v54_v46  ;;  %607 = vmatmul.msk.f32.gmra.mxu3 %vm77_vm0, %v70_v47 }
  0x5f   :  { %559 = vmatmul.msk.f32.gmra.mxu0 %vm77_vm0, %v22_v48  ;;  %575 = vmatmul.msk.f32.gmra.mxu1 %vm77_vm0, %v38_v49 }
  0x65   :  { %592 = vmatmul.msk.f32.gmra.mxu2 %vm77_vm0, %v55_v50  ;;  %608 = vmatmul.msk.f32.gmra.mxu3 %vm77_vm0, %v71_v51 }
  0x67   :  { %560 = vmatmul.msk.f32.gmra.mxu0 %vm77_vm0, %v23_v52  ;;  %576 = vmatmul.msk.f32.gmra.mxu1 %vm77_vm0, %v39_v53 }
  0x6d   :  { %593 = vmatmul.msk.f32.gmra.mxu2 %vm77_vm0, %v56_v54  ;;  %609 = vmatmul.msk.f32.gmra.mxu3 %vm77_vm0, %v72_v55 }
  0x6f   :  { %561 = vmatmul.msk.f32.gmra.mxu0 %vm77_vm0, %v24_v56  ;;  %577 = vmatmul.msk.f32.gmra.mxu1 %vm77_vm0, %v40_v57 }
  0x75   :  { %594 = vmatmul.msk.f32.gmra.mxu2 %vm77_vm0, %v57_v58  ;;  %610 = vmatmul.msk.f32.gmra.mxu3 %vm77_vm0, %v73_v59 }
  0x77   :  { %562 = vmatmul.msk.f32.gmra.mxu0 %vm77_vm0, %v25_v60  ;;  %578 = vmatmul.msk.f32.gmra.mxu1 %vm77_vm0, %v41_v61 }
  0x7d   :  { %595 = vmatmul.msk.f32.gmra.mxu2 %vm77_vm0, %v58_v62  ;;  %611 = vmatmul.msk.f32.gmra.mxu3 %vm77_vm0, %v74_v63 }
  0x7f   :  { %563 = vmatmul.msk.f32.gmra.mxu0 %vm77_vm0, %v26_v0  ;;  %579 = vmatmul.msk.f32.gmra.mxu1 %vm77_vm0, %v42_v1 }
  0x84   :  { %v287_v2 = vpop.f32.mrf.mxu0  ;;  %v335_v3 = vpop.f32.mrf.mxu1 }
  0x85   :  { %480 = vst.msk [vmem:[%s1153_s2] sm:$0xff] %vm479_vm1, %v287_v2 }
  0x86   :  { %496 = vst.msk [vmem:[%s1153_s2 + $0x80] sm:$0xff] %vm479_vm1, %v335_v3 }
  0x88   :  { %v383_v4 = vpop.f32.mrf.mxu2  ;;  %v431_v5 = vpop.f32.mrf.mxu3 }
  0x89   :  { %512 = vst.msk [vmem:[%s1153_s2 + $0x100] sm:$0xff] %vm479_vm1, %v383_v4 }
  0x8a   :  { %528 = vst.msk [vmem:[%s1153_s2 + $0x180] sm:$0xff] %vm479_vm1, %v431_v5 }
  0x8c   :  { %v290_v6 = vpop.f32.mrf.mxu0  ;;  %v338_v7 = vpop.f32.mrf.mxu1 }
  0x8d   :  { %481 = vst.msk [vmem:[%s1153_s2 + $0x8] sm:$0xff] %vm479_vm1, %v290_v6 }
  0x8e   :  { %497 = vst.msk [vmem:[%s1153_s2 + $0x88] sm:$0xff] %vm479_vm1, %v338_v7 }
  0x90   :  { %v386_v8 = vpop.f32.mrf.mxu2  ;;  %v434_v9 = vpop.f32.mrf.mxu3 }
  0x91   :  { %513 = vst.msk [vmem:[%s1153_s2 + $0x108] sm:$0xff] %vm479_vm1, %v386_v8 }
  0x92   :  { %529 = vst.msk [vmem:[%s1153_s2 + $0x188] sm:$0xff] %vm479_vm1, %v434_v9 }
  0x94   :  { %v293_v10 = vpop.f32.mrf.mxu0  ;;  %v341_v11 = vpop.f32.mrf.mxu1 }
  0x95   :  { %482 = vst.msk [vmem:[%s1153_s2 + $0x10] sm:$0xff] %vm479_vm1, %v293_v10 }
  0x96   :  { %498 = vst.msk [vmem:[%s1153_s2 + $0x90] sm:$0xff] %vm479_vm1, %v341_v11 }
  0x98   :  { %v389_v12 = vpop.f32.mrf.mxu2  ;;  %v437_v13 = vpop.f32.mrf.mxu3 }
  0x99   :  { %514 = vst.msk [vmem:[%s1153_s2 + $0x110] sm:$0xff] %vm479_vm1, %v389_v12 }
  0x9a   :  { %530 = vst.msk [vmem:[%s1153_s2 + $0x190] sm:$0xff] %vm479_vm1, %v437_v13 }
  0x9c   :  { %v296_v14 = vpop.f32.mrf.mxu0  ;;  %v344_v15 = vpop.f32.mrf.mxu1 }
  0x9d   :  { %483 = vst.msk [vmem:[%s1153_s2 + $0x18] sm:$0xff] %vm479_vm1, %v296_v14 }
  0x9e   :  { %499 = vst.msk [vmem:[%s1153_s2 + $0x98] sm:$0xff] %vm479_vm1, %v344_v15 }
  0xa0   :  { %v392_v16 = vpop.f32.mrf.mxu2  ;;  %v440_v17 = vpop.f32.mrf.mxu3 }
  0xa1   :  { %515 = vst.msk [vmem:[%s1153_s2 + $0x118] sm:$0xff] %vm479_vm1, %v392_v16 }
  0xa2   :  { %531 = vst.msk [vmem:[%s1153_s2 + $0x198] sm:$0xff] %vm479_vm1, %v440_v17 }
  0xa4   :  { %v299_v18 = vpop.f32.mrf.mxu0  ;;  %v347_v19 = vpop.f32.mrf.mxu1 }
  0xa5   :  { %484 = vst.msk [vmem:[%s1153_s2 + $0x20] sm:$0xff] %vm479_vm1, %v299_v18 }
  0xa6   :  { %500 = vst.msk [vmem:[%s1153_s2 + $0xa0] sm:$0xff] %vm479_vm1, %v347_v19 }
  0xa8   :  { %v395_v20 = vpop.f32.mrf.mxu2  ;;  %v443_v21 = vpop.f32.mrf.mxu3 }
  0xa9   :  { %516 = vst.msk [vmem:[%s1153_s2 + $0x120] sm:$0xff] %vm479_vm1, %v395_v20 }
  0xaa   :  { %532 = vst.msk [vmem:[%s1153_s2 + $0x1a0] sm:$0xff] %vm479_vm1, %v443_v21 }
  0xac   :  { %v302_v22 = vpop.f32.mrf.mxu0  ;;  %v350_v23 = vpop.f32.mrf.mxu1 }
  0xad   :  { %485 = vst.msk [vmem:[%s1153_s2 + $0x28] sm:$0xff] %vm479_vm1, %v302_v22 }
  0xae   :  { %501 = vst.msk [vmem:[%s1153_s2 + $0xa8] sm:$0xff] %vm479_vm1, %v350_v23 }
  0xb0   :  { %v398_v24 = vpop.f32.mrf.mxu2  ;;  %v446_v25 = vpop.f32.mrf.mxu3 }
  0xb1   :  { %517 = vst.msk [vmem:[%s1153_s2 + $0x128] sm:$0xff] %vm479_vm1, %v398_v24 }
  0xb2   :  { %533 = vst.msk [vmem:[%s1153_s2 + $0x1a8] sm:$0xff] %vm479_vm1, %v446_v25 }
  0xb4   :  { %v305_v26 = vpop.f32.mrf.mxu0  ;;  %v353_v27 = vpop.f32.mrf.mxu1 }
  0xb5   :  { %486 = vst.msk [vmem:[%s1153_s2 + $0x30] sm:$0xff] %vm479_vm1, %v305_v26 }
  0xb6   :  { %502 = vst.msk [vmem:[%s1153_s2 + $0xb0] sm:$0xff] %vm479_vm1, %v353_v27 }
  0xb8   :  { %v401_v28 = vpop.f32.mrf.mxu2  ;;  %v449_v29 = vpop.f32.mrf.mxu3 }
  0xb9   :  { %518 = vst.msk [vmem:[%s1153_s2 + $0x130] sm:$0xff] %vm479_vm1, %v401_v28 }
  0xba   :  { %534 = vst.msk [vmem:[%s1153_s2 + $0x1b0] sm:$0xff] %vm479_vm1, %v449_v29 }
  0xbc   :  { %v308_v30 = vpop.f32.mrf.mxu0  ;;  %v356_v31 = vpop.f32.mrf.mxu1 }
  0xbd   :  { %487 = vst.msk [vmem:[%s1153_s2 + $0x38] sm:$0xff] %vm479_vm1, %v308_v30 }
  0xbe   :  { %503 = vst.msk [vmem:[%s1153_s2 + $0xb8] sm:$0xff] %vm479_vm1, %v356_v31 }
  0xc0   :  { %v404_v32 = vpop.f32.mrf.mxu2  ;;  %v452_v33 = vpop.f32.mrf.mxu3 }
  0xc1   :  { %519 = vst.msk [vmem:[%s1153_s2 + $0x138] sm:$0xff] %vm479_vm1, %v404_v32 }
  0xc2   :  { %535 = vst.msk [vmem:[%s1153_s2 + $0x1b8] sm:$0xff] %vm479_vm1, %v452_v33 }
  0xc4   :  { %v311_v34 = vpop.f32.mrf.mxu0  ;;  %v359_v35 = vpop.f32.mrf.mxu1 }
  0xc5   :  { %488 = vst.msk [vmem:[%s1153_s2 + $0x40] sm:$0xff] %vm479_vm1, %v311_v34 }
  0xc6   :  { %504 = vst.msk [vmem:[%s1153_s2 + $0xc0] sm:$0xff] %vm479_vm1, %v359_v35 }
  0xc8   :  { %v407_v36 = vpop.f32.mrf.mxu2  ;;  %v455_v37 = vpop.f32.mrf.mxu3 }
  0xc9   :  { %520 = vst.msk [vmem:[%s1153_s2 + $0x140] sm:$0xff] %vm479_vm1, %v407_v36 }
  0xca   :  { %536 = vst.msk [vmem:[%s1153_s2 + $0x1c0] sm:$0xff] %vm479_vm1, %v455_v37 }
  0xcc   :  { %v314_v38 = vpop.f32.mrf.mxu0  ;;  %v362_v39 = vpop.f32.mrf.mxu1 }
  0xcd   :  { %489 = vst.msk [vmem:[%s1153_s2 + $0x48] sm:$0xff] %vm479_vm1, %v314_v38 }
  0xce   :  { %505 = vst.msk [vmem:[%s1153_s2 + $0xc8] sm:$0xff] %vm479_vm1, %v362_v39 }
  0xd0   :  { %v410_v40 = vpop.f32.mrf.mxu2  ;;  %v458_v41 = vpop.f32.mrf.mxu3 }
  0xd1   :  { %521 = vst.msk [vmem:[%s1153_s2 + $0x148] sm:$0xff] %vm479_vm1, %v410_v40 }
  0xd2   :  { %537 = vst.msk [vmem:[%s1153_s2 + $0x1c8] sm:$0xff] %vm479_vm1, %v458_v41 }
  0xd4   :  { %v317_v42 = vpop.f32.mrf.mxu0  ;;  %v365_v43 = vpop.f32.mrf.mxu1 }
  0xd5   :  { %490 = vst.msk [vmem:[%s1153_s2 + $0x50] sm:$0xff] %vm479_vm1, %v317_v42 }
  0xd6   :  { %506 = vst.msk [vmem:[%s1153_s2 + $0xd0] sm:$0xff] %vm479_vm1, %v365_v43 }
  0xd8   :  { %v413_v44 = vpop.f32.mrf.mxu2  ;;  %v461_v45 = vpop.f32.mrf.mxu3 }
  0xd9   :  { %522 = vst.msk [vmem:[%s1153_s2 + $0x150] sm:$0xff] %vm479_vm1, %v413_v44 }
  0xda   :  { %538 = vst.msk [vmem:[%s1153_s2 + $0x1d0] sm:$0xff] %vm479_vm1, %v461_v45 }
  0xdc   :  { %v320_v46 = vpop.f32.mrf.mxu0  ;;  %v368_v47 = vpop.f32.mrf.mxu1 }
  0xdd   :  { %491 = vst.msk [vmem:[%s1153_s2 + $0x58] sm:$0xff] %vm479_vm1, %v320_v46 }
  0xde   :  { %507 = vst.msk [vmem:[%s1153_s2 + $0xd8] sm:$0xff] %vm479_vm1, %v368_v47 }
  0xe0   :  { %v416_v48 = vpop.f32.mrf.mxu2  ;;  %v464_v49 = vpop.f32.mrf.mxu3 }
  0xe1   :  { %523 = vst.msk [vmem:[%s1153_s2 + $0x158] sm:$0xff] %vm479_vm1, %v416_v48 }
  0xe2   :  { %539 = vst.msk [vmem:[%s1153_s2 + $0x1d8] sm:$0xff] %vm479_vm1, %v464_v49 }
  0xe4   :  { %v323_v50 = vpop.f32.mrf.mxu0  ;;  %v371_v51 = vpop.f32.mrf.mxu1 }
  0xe5   :  { %492 = vst.msk [vmem:[%s1153_s2 + $0x60] sm:$0xff] %vm479_vm1, %v323_v50 }
  0xe6   :  { %508 = vst.msk [vmem:[%s1153_s2 + $0xe0] sm:$0xff] %vm479_vm1, %v371_v51 }
  0xe8   :  { %v419_v52 = vpop.f32.mrf.mxu2  ;;  %v467_v53 = vpop.f32.mrf.mxu3 }
  0xe9   :  { %524 = vst.msk [vmem:[%s1153_s2 + $0x160] sm:$0xff] %vm479_vm1, %v419_v52 }
  0xea   :  { %540 = vst.msk [vmem:[%s1153_s2 + $0x1e0] sm:$0xff] %vm479_vm1, %v467_v53 }
  0xec   :  { %v326_v54 = vpop.f32.mrf.mxu0  ;;  %v374_v55 = vpop.f32.mrf.mxu1 }
  0xed   :  { %493 = vst.msk [vmem:[%s1153_s2 + $0x68] sm:$0xff] %vm479_vm1, %v326_v54 }
  0xee   :  { %509 = vst.msk [vmem:[%s1153_s2 + $0xe8] sm:$0xff] %vm479_vm1, %v374_v55 }
  0xf0   :  { %v422_v56 = vpop.f32.mrf.mxu2  ;;  %v470_v57 = vpop.f32.mrf.mxu3 }
  0xf1   :  { %525 = vst.msk [vmem:[%s1153_s2 + $0x168] sm:$0xff] %vm479_vm1, %v422_v56 }
  0xf2   :  { %541 = vst.msk [vmem:[%s1153_s2 + $0x1e8] sm:$0xff] %vm479_vm1, %v470_v57 }
  0xf4   :  { %v329_v58 = vpop.f32.mrf.mxu0  ;;  %v377_v59 = vpop.f32.mrf.mxu1 }
  0xf5   :  { %494 = vst.msk [vmem:[%s1153_s2 + $0x70] sm:$0xff] %vm479_vm1, %v329_v58 }
  0xf6   :  { %510 = vst.msk [vmem:[%s1153_s2 + $0xf0] sm:$0xff] %vm479_vm1, %v377_v59 }
  0xf8   :  { %v425_v60 = vpop.f32.mrf.mxu2  ;;  %v473_v61 = vpop.f32.mrf.mxu3 }
  0xf9   :  { %526 = vst.msk [vmem:[%s1153_s2 + $0x170] sm:$0xff] %vm479_vm1, %v425_v60 }
  0xfa   :  { %542 = vst.msk [vmem:[%s1153_s2 + $0x1f0] sm:$0xff] %vm479_vm1, %v473_v61 }
  0xfc   :  { %v332_v62 = vpop.f32.mrf.mxu0  ;;  %v380_v63 = vpop.f32.mrf.mxu1 }
  0xfd   :  { %495 = vst.msk [vmem:[%s1153_s2 + $0x78] sm:$0xff] %vm479_vm1, %v332_v62 }
  0xfe   :  { %511 = vst.msk [vmem:[%s1153_s2 + $0xf8] sm:$0xff] %vm479_vm1, %v380_v63 }
 0x100   :  { %v428_v0 = vpop.f32.mrf.mxu2  ;;  %v476_v1 = vpop.f32.mrf.mxu3 }
 0x101   :  { %527 = vst.msk [vmem:[%s1153_s2 + $0x178] sm:$0xff] %vm479_vm1, %v428_v0 }
 0x102   :  { %543 = vst.msk [vmem:[%s1153_s2 + $0x1f8] sm:$0xff] %vm479_vm1, %v476_v1 }

</bundles_post_ra>
